<compile_context>
chip_gen: v6e
topology: v6e:2x2x1
jax: 0.10.0
libtpu: 0.0.40
codegen_flags: <defaults>
</compile_context>

<pallas_src>
import functools

import jax
import jax.numpy as jnp
from jax.experimental import pallas as pl
from jax.experimental.pallas import tpu as pltpu


# ---------------------------------------------------------------------------
# Kernel A: coefficient kernel (encode + bandwidth + bubble window), per
# batch tile.  coeff[b, m*n + i] = (e[b,i] / wsum[b,i]) * win[b,i,m].
# ---------------------------------------------------------------------------
def coeff_kernel(x_ref, wenc_ref, benc_ref, wbw_ref, bbw_ref, rep_ref, msq_ref,
                 coeff_ref, *, mu, approx_recip=False):
    # x_ref:     [TB, N_in]   input tile (batch tile, full feature dim)
    # wenc_ref:  [N_in, n]    encoder weight (transposed), compute dtype
    # benc_ref:  [1, n]       encoder bias, f32
    # wbw_ref:   [n, n]       bandwidth weight (transposed), compute dtype
    # bbw_ref:   [1, n]       bandwidth bias, f32
    # rep_ref:   [n, mu*n]    0/1 replication matrix: rep[i, m*n+i] = 1, f32
    # msq_ref:   [1, mu*n]    msq[0, m*n+i] = m^2, f32
    # coeff_ref: [TB, mu*n]   output tile, compute dtype
    x = x_ref[...]
    w_dt = wenc_ref.dtype  # matmul compute dtype (f32 or bf16)

    # encode: [TB, N_in] @ [N_in, n] + [1, n] -> [TB, n] (f32 accumulate)
    e = jnp.dot(x, wenc_ref[...], preferred_element_type=jnp.float32) + benc_ref[...]

    # bandwidth: sigmoid([TB, n] @ [n, n] + [1, n]) -> [TB, n] (f32 VPU/EUP)
    z = jnp.dot(e.astype(w_dt), wbw_ref[...],
                preferred_element_type=jnp.float32) + bbw_ref[...]
    w = jax.nn.sigmoid(z)

    # Bubble-window normalizer on the small [TB, n] tile.  Clamp the
    # denominator so sigmoid underflow (w -> 0) cannot send inf through the
    # replication matmul below (inf * 0 -> NaN across the whole batch row).
    denom = jnp.maximum((w * float(mu)) ** 2, 1e-30)
    inv_denom = pl.reciprocal(denom, approx=approx_recip)                 # [TB, n]
    wsum = jnp.ones_like(w)                                               # m = 0 term
    for m in range(1, mu):
        wsum = wsum + jnp.maximum(1.0 - float(m * m) * inv_denom, 0.0)
    e_scaled = e * pl.reciprocal(wsum, approx=approx_recip)               # [TB, n]

    # Replicate [TB, n] -> [TB, mu*n] (m-major blocks) via a tiny 0/1 matmul
    # (guaranteed Mosaic lowering; avoids lane-dim concatenation).
    rep = rep_ref[...]
    e_rep = jnp.dot(e_scaled, rep, preferred_element_type=jnp.float32)    # [TB, mu*n]
    d_rep = jnp.dot(inv_denom, rep, preferred_element_type=jnp.float32)   # [TB, mu*n]

    # win_all[b, m*n+i] = relu(1 - m^2 / (w[b,i]*mu)^2); m=0 block forced to
    # exactly 1.0 (intentional NaN-safe deviation from the reference when
    # w underflows to 0).
    msq = msq_ref[...]                                                    # [1, mu*n]
    win_all = jnp.where(msq == 0.0, 1.0, jnp.maximum(1.0 - msq * d_rep, 0.0))
    coeff_ref[...] = (e_rep * win_all).astype(coeff_ref.dtype)


# ---------------------------------------------------------------------------
# Kernel B: decode matmul, out tile = coeff tile @ basis2d tile.  K = mu*n is
# contracted in a single MXU dot.
# TODO(synk): add a K grid axis if mu*n grows beyond a few thousand.
# ---------------------------------------------------------------------------
def decode_kernel(coeff_ref, basis_ref, out_ref):
    out_ref[...] = jnp.dot(coeff_ref[...], basis_ref[...],
                           preferred_element_type=jnp.float32).astype(out_ref.dtype)


# ---------------------------------------------------------------------------
# Parameter preprocessing (input-independent; do once per parameter set).
# ---------------------------------------------------------------------------
def precompute_basis(decoder, neighbours, mu):
    """decoder: [n, N], neighbours: [N, mu] ->
    basis2d: [mu*n, N], basis2d[m*n+i, j] = decoder[i, neighbours[j, m]]."""
    n, N = decoder.shape
    gathered = decoder[:, neighbours]              # [n, N, mu]
    basis = jnp.transpose(gathered, (2, 0, 1))     # [mu, n, N]
    return basis.reshape(mu * n, N)


def make_rep_msq(n, mu):
    """Constant helpers for the in-kernel lane replication (built once)."""
    rep = jnp.tile(jnp.eye(n, dtype=jnp.float32), (1, mu))      # [n, mu*n]
    m = jnp.arange(mu, dtype=jnp.float32)
    msq = jnp.repeat(m * m, n)[None, :]                         # [1, mu*n]
    return rep, msq


def _default_tile_n(n_out):
    # Largest multiple-of-128 divisor of n_out up to 2048 (amortizes the
    # ~0.35 us per-grid-step overhead, keeps stores lane-dense); full extent
    # if n_out is not 128-aligned.
    for cand in (2048, 1024, 512, 256, 128):
        if n_out % cand == 0:
            return cand
    return n_out


def _default_tile_b(b, sub):
    # Full batch for small B (coeff / x tiles are tiny); otherwise the largest
    # MXU-friendly divisor that respects sublane packing `sub`.
    if b <= 256:
        return b
    for cand in (256, 128, 64, 32, 16):
        if b % cand == 0 and cand % sub == 0:
            return cand
    return b


def _vmem_limit(est_bytes):
    # Explicit scoped-VMEM budget: at least the 32 MiB default, at most 60 MiB
    # so the same build stays inside v7x's 64 MiB per-TC VMEM.
    return int(min(max(2 * est_bytes, 32 << 20), 60 << 20))


def nrbs_forward(x, wenc_t, benc, wbw_t, bbw, basis2d, rep, msq, mu, *,
                 tile_b=None, tile_n=None, compute_dtype=jnp.bfloat16,
                 approx_recip=False):
    """Pallas forward.  x:[B,N_in]; wenc_t:[N_in,n]; wbw_t:[n,n];
    basis2d:[mu*n,N_out] from precompute_basis; rep/msq from make_rep_msq."""
    B, N_in = x.shape
    n = wenc_t.shape[1]
    K, N_out = basis2d.shape
    assert K == mu * n

    cdt = jnp.dtype(compute_dtype)
    sub = 16 if cdt.itemsize == 2 else 8           # bf16 sublane packing is 16
    tile_b = _default_tile_b(B, sub) if tile_b is None else tile_b
    tile_n = _default_tile_n(N_out) if tile_n is None else tile_n
    assert B % tile_b == 0 and N_out % tile_n == 0
    assert tile_b == B or tile_b % sub == 0
    assert tile_n == N_out or tile_n % 128 == 0

    # MXU operands in the compute dtype (bf16 halves the dominant basis-stream
    # HBM bytes and doubles MXU rate); biases, window math and accumulation f32.
    x_c = x.astype(cdt)
    wenc_c = wenc_t.astype(cdt)
    wbw_c = wbw_t.astype(cdt)
    basis_c = basis2d.astype(cdt)
    benc_c = benc.reshape(1, n).astype(jnp.float32)
    bbw_c = bbw.reshape(1, n).astype(jnp.float32)
    rep_c = rep.astype(jnp.float32)
    msq_c = msq.astype(jnp.float32)
    dsz = cdt.itemsize

    # ---- Kernel A: coeff [B, K], grid over batch tiles only (the whole
    # encoder / bandwidth / window path is hoisted out of the output-N loop).
    est_a = (2 * tile_b * (N_in + K) * dsz
             + (N_in * n + n * n) * dsz + (n * K + 2 * n + K) * 4)
    coeff = pl.pallas_call(
        functools.partial(coeff_kernel, mu=mu, approx_recip=approx_recip),
        out_shape=jax.ShapeDtypeStruct((B, K), cdt),
        grid_spec=pltpu.PrefetchScalarGridSpec(
            num_scalar_prefetch=0,
            grid=(B // tile_b,),
            in_specs=[
                pl.BlockSpec((tile_b, N_in), lambda i: (i, 0)),   # x tile
                pl.BlockSpec((N_in, n), lambda i: (0, 0)),        # encoder weight (full)
                pl.BlockSpec((1, n), lambda i: (0, 0)),           # encoder bias
                pl.BlockSpec((n, n), lambda i: (0, 0)),           # bandwidth weight
                pl.BlockSpec((1, n), lambda i: (0, 0)),           # bandwidth bias
                pl.BlockSpec((n, K), lambda i: (0, 0)),           # replication matrix
                pl.BlockSpec((1, K), lambda i: (0, 0)),           # m^2 row
            ],
            out_specs=pl.BlockSpec((tile_b, K), lambda i: (i, 0)),
        ),
        compiler_params=pltpu.CompilerParams(
            dimension_semantics=("parallel",),
            vmem_limit_bytes=_vmem_limit(est_a)),
    )(x_c, wenc_c, benc_c, wbw_c, bbw_c, rep_c, msq_c)

    # ---- Kernel B: out = coeff @ basis2d, tiled over (j = output-N tiles,
    # i = batch tiles).  j is the OUTER grid axis so the basis block index is
    # constant across the inner i steps -> basis2d is streamed from HBM
    # exactly once; only the tiny coeff tiles are revisited.
    est_b = 2 * (K * tile_n * dsz + tile_b * K * dsz + tile_b * tile_n * 4)
    out = pl.pallas_call(
        decode_kernel,
        out_shape=jax.ShapeDtypeStruct((B, N_out), jnp.float32),
        grid_spec=pltpu.PrefetchScalarGridSpec(
            num_scalar_prefetch=0,
            grid=(N_out // tile_n, B // tile_b),
            in_specs=[
                pl.BlockSpec((tile_b, K), lambda j, i: (i, 0)),     # coeff tile (tiny)
                pl.BlockSpec((K, tile_n), lambda j, i: (0, j)),     # basis stream (dominant bytes)
            ],
            out_specs=pl.BlockSpec((tile_b, tile_n), lambda j, i: (i, j)),
        ),
        compiler_params=pltpu.CompilerParams(
            dimension_semantics=("parallel", "parallel"),
            vmem_limit_bytes=_vmem_limit(est_b)),
    )(coeff, basis_c)
    return out


def nrbs_reference(x, wenc_t, benc, wbw_t, bbw, decoder, neighbours, mu):
    # Pure-JAX reference mirroring the PyTorch module.
    e = x @ wenc_t + benc                                        # [B, n]
    w = jax.nn.sigmoid(e @ wbw_t + bbw)                          # [B, n]
    m = jnp.arange(mu, dtype=jnp.float32)                        # [mu]
    win = jnp.maximum(1.0 - (m[None, None, :] ** 2) / ((w * mu) ** 2)[..., None], 0.0)
    win = win / jnp.sum(win, axis=-1, keepdims=True)             # [B, n, mu]
    basis = decoder[:, neighbours]                               # [n, N, mu]
    return jnp.einsum("bi,bim,ijm->bj", e, win, basis)


if __name__ == "__main__":
    # Small, TPU-friendly shapes; mu*n = 128 fills the fused-matmul K dim.
    B, N, n, mu = 8, 2048, 16, 8

    key = jax.random.PRNGKey(0)
    k_x, k_we, k_be, k_wb, k_bb, k_dec = jax.random.split(key, 6)

    # Deterministic parameter init (torch.nn.Linear-style uniform bounds).
    bound_enc = 1.0 / jnp.sqrt(float(N))
    wenc = jax.random.uniform(k_we, (n, N), jnp.float32, -bound_enc, bound_enc)   # Linear(N, n).weight
    benc = jax.random.uniform(k_be, (n,), jnp.float32, -bound_enc, bound_enc)
    bound_bw = 1.0 / jnp.sqrt(float(n))
    wbw = jax.random.uniform(k_wb, (n, n), jnp.float32, -bound_bw, bound_bw)      # Linear(n, n).weight
    bbw = jax.random.uniform(k_bb, (n,), jnp.float32, -bound_bw, bound_bw)
    decoder = jax.random.uniform(k_dec, (n, N), jnp.float32, -0.01, 0.01)

    # neighbours[j] = (j, j+1, ..., j+mu-1) mod N  (deterministic stencil).
    neighbours = (jnp.arange(N, dtype=jnp.int32)[:, None]
                  + jnp.arange(mu, dtype=jnp.int32)[None, :]) % N                 # [N, mu]

    x = jax.random.normal(k_x, (B, N), jnp.float32)

    # Hoisted, input-independent preprocessing (done once, reused every call).
    basis2d = precompute_basis(decoder, neighbours, mu)          # [mu*n, N]
    rep, msq = make_rep_msq(n, mu)

    # f32 path: exact parity with the PyTorch reference (decode grid = 4 x 1).
    out_f32 = nrbs_forward(x, wenc.T, benc, wbw.T, bbw, basis2d, rep, msq, mu,
                           tile_n=512, compute_dtype=jnp.float32)
    out_f32 = jax.block_until_ready(out_f32)

    ref = nrbs_reference(x, wenc.T, benc, wbw.T, bbw, decoder, neighbours, mu)
    assert out_f32.shape == (B, N)
    assert jnp.allclose(out_f32, ref, atol=1e-4, rtol=1e-4), \
        "Pallas f32 kernel mismatch vs reference"

    # Default production path (bf16 MXU operands, f32 accumulation / window
    # math): checked for accuracy against the f32 path, not just finiteness.
    out_bf16 = nrbs_forward(x, wenc.T, benc, wbw.T, bbw, basis2d, rep, msq, mu)
    out_bf16 = jax.block_until_ready(out_bf16)
    assert out_bf16.shape == (B, N)
    assert bool(jnp.all(jnp.isfinite(out_bf16)))
    assert jnp.allclose(out_bf16, out_f32, atol=2e-2, rtol=2e-2), \
        "Pallas bf16 kernel drifted too far from the f32 path"

    print("KERNEL_OK")
</pallas_src>

<mosaic_0001>
module attributes {stable_mosaic.version = 11 : i64} {
  func.func @coeff_kernel(%arg0: i32, %arg1: memref<8x2048xf32, #tpu.memory_space<vmem>>, %arg2: memref<2048x16xf32, #tpu.memory_space<vmem>>, %arg3: memref<1x16xf32, #tpu.memory_space<vmem>>, %arg4: memref<16x16xf32, #tpu.memory_space<vmem>>, %arg5: memref<1x16xf32, #tpu.memory_space<vmem>>, %arg6: memref<16x128xf32, #tpu.memory_space<vmem>>, %arg7: memref<1x128xf32, #tpu.memory_space<vmem>>, %arg8: memref<8x128xf32, #tpu.memory_space<vmem>>) attributes {dimension_semantics = [#tpu.dimension_semantics<parallel>], iteration_bounds = array<i64: 1>, scalar_prefetch = 0 : i64, scratch_operands = 0 : i64, tpu.core_type = #tpu.core_type<tc>, window_params = [{transform_indices = @transform_0, window_bounds = array<i64: 8, 2048>}, {pipeline_mode = #tpu.pipeline_mode<synchronous>, transform_indices = @transform_1, window_bounds = array<i64: 2048, 16>}, {pipeline_mode = #tpu.pipeline_mode<synchronous>, transform_indices = @transform_2, window_bounds = array<i64: 1, 16>}, {pipeline_mode = #tpu.pipeline_mode<synchronous>, transform_indices = @transform_3, window_bounds = array<i64: 16, 16>}, {pipeline_mode = #tpu.pipeline_mode<synchronous>, transform_indices = @transform_4, window_bounds = array<i64: 1, 16>}, {pipeline_mode = #tpu.pipeline_mode<synchronous>, transform_indices = @transform_5, window_bounds = array<i64: 16, 128>}, {pipeline_mode = #tpu.pipeline_mode<synchronous>, transform_indices = @transform_6, window_bounds = array<i64: 1, 128>}, {transform_indices = @transform_7, window_bounds = array<i64: 8, 128>}]} {
    %c0 = arith.constant 0 : index
    %c0_0 = arith.constant 0 : index
    %0 = vector.load %arg1[%c0, %c0_0] : memref<8x2048xf32, #tpu.memory_space<vmem>>, vector<8x2048xf32>
    %c0_1 = arith.constant 0 : index
    %c0_2 = arith.constant 0 : index
    %1 = vector.load %arg2[%c0_1, %c0_2] : memref<2048x16xf32, #tpu.memory_space<vmem>>, vector<2048x16xf32>
    %cst = arith.constant dense<0.000000e+00> : vector<8x16xf32>
    %2 = tpu.matmul %0, %1, %cst {dimension_numbers = #tpu.dot_dimension_numbers<[1], [0], [0], [1], [0, 0, 1, 1], [], []>} : vector<8x2048xf32>, vector<2048x16xf32>, vector<8x16xf32> -> vector<8x16xf32>
    %c0_3 = arith.constant 0 : index
    %c0_4 = arith.constant 0 : index
    %3 = vector.load %arg3[%c0_3, %c0_4] : memref<1x16xf32, #tpu.memory_space<vmem>>, vector<1x16xf32>
    %4 = vector.broadcast %3 : vector<1x16xf32> to vector<8x16xf32>
    %5 = arith.addf %2, %4 : vector<8x16xf32>
    %c0_5 = arith.constant 0 : index
    %c0_6 = arith.constant 0 : index
    %6 = vector.load %arg4[%c0_5, %c0_6] : memref<16x16xf32, #tpu.memory_space<vmem>>, vector<16x16xf32>
    %cst_7 = arith.constant dense<0.000000e+00> : vector<8x16xf32>
    %7 = tpu.matmul %5, %6, %cst_7 {dimension_numbers = #tpu.dot_dimension_numbers<[1], [0], [0], [1], [0, 0, 1, 1], [], []>} : vector<8x16xf32>, vector<16x16xf32>, vector<8x16xf32> -> vector<8x16xf32>
    %c0_8 = arith.constant 0 : index
    %c0_9 = arith.constant 0 : index
    %8 = vector.load %arg5[%c0_8, %c0_9] : memref<1x16xf32, #tpu.memory_space<vmem>>, vector<1x16xf32>
    %9 = vector.broadcast %8 : vector<1x16xf32> to vector<8x16xf32>
    %10 = arith.addf %7, %9 : vector<8x16xf32>
    %11 = arith.negf %10 : vector<8x16xf32>
    %12 = math.exp %11 : vector<8x16xf32>
    %cst_10 = arith.constant 1.000000e+00 : f32
    %13 = vector.broadcast %cst_10 : f32 to vector<8x16xf32>
    %14 = arith.addf %13, %12 : vector<8x16xf32>
    %15 = arith.divf %13, %14 : vector<8x16xf32>
    %cst_11 = arith.constant 8.000000e+00 : f32
    %16 = vector.broadcast %cst_11 : f32 to vector<8x16xf32>
    %17 = arith.mulf %15, %16 : vector<8x16xf32>
    %18 = arith.mulf %17, %17 : vector<8x16xf32>
    %cst_12 = arith.constant 1.000000e-30 : f32
    %19 = vector.broadcast %cst_12 : f32 to vector<8x16xf32>
    %20 = arith.maximumf %18, %19 : vector<8x16xf32>
    %21 = tpu.reciprocal %20 : vector<8x16xf32> -> vector<8x16xf32>
    %cst_13 = arith.constant 1.000000e+00 : f32
    %22 = vector.broadcast %cst_13 : f32 to vector<8x16xf32>
    %cst_14 = arith.constant 1.000000e+00 : f32
    %23 = vector.broadcast %cst_14 : f32 to vector<8x16xf32>
    %24 = arith.mulf %23, %21 : vector<8x16xf32>
    %cst_15 = arith.constant 1.000000e+00 : f32
    %25 = vector.broadcast %cst_15 : f32 to vector<8x16xf32>
    %26 = arith.subf %25, %24 : vector<8x16xf32>
    %cst_16 = arith.constant 0.000000e+00 : f32
    %27 = vector.broadcast %cst_16 : f32 to vector<8x16xf32>
    %28 = arith.maximumf %26, %27 : vector<8x16xf32>
    %29 = arith.addf %22, %28 : vector<8x16xf32>
    %cst_17 = arith.constant 4.000000e+00 : f32
    %30 = vector.broadcast %cst_17 : f32 to vector<8x16xf32>
    %31 = arith.mulf %30, %21 : vector<8x16xf32>
    %cst_18 = arith.constant 1.000000e+00 : f32
    %32 = vector.broadcast %cst_18 : f32 to vector<8x16xf32>
    %33 = arith.subf %32, %31 : vector<8x16xf32>
    %cst_19 = arith.constant 0.000000e+00 : f32
    %34 = vector.broadcast %cst_19 : f32 to vector<8x16xf32>
    %35 = arith.maximumf %33, %34 : vector<8x16xf32>
    %36 = arith.addf %29, %35 : vector<8x16xf32>
    %cst_20 = arith.constant 9.000000e+00 : f32
    %37 = vector.broadcast %cst_20 : f32 to vector<8x16xf32>
    %38 = arith.mulf %37, %21 : vector<8x16xf32>
    %cst_21 = arith.constant 1.000000e+00 : f32
    %39 = vector.broadcast %cst_21 : f32 to vector<8x16xf32>
    %40 = arith.subf %39, %38 : vector<8x16xf32>
    %cst_22 = arith.constant 0.000000e+00 : f32
    %41 = vector.broadcast %cst_22 : f32 to vector<8x16xf32>
    %42 = arith.maximumf %40, %41 : vector<8x16xf32>
    %43 = arith.addf %36, %42 : vector<8x16xf32>
    %cst_23 = arith.constant 1.600000e+01 : f32
    %44 = vector.broadcast %cst_23 : f32 to vector<8x16xf32>
    %45 = arith.mulf %44, %21 : vector<8x16xf32>
    %cst_24 = arith.constant 1.000000e+00 : f32
    %46 = vector.broadcast %cst_24 : f32 to vector<8x16xf32>
    %47 = arith.subf %46, %45 : vector<8x16xf32>
    %cst_25 = arith.constant 0.000000e+00 : f32
    %48 = vector.broadcast %cst_25 : f32 to vector<8x16xf32>
    %49 = arith.maximumf %47, %48 : vector<8x16xf32>
    %50 = arith.addf %43, %49 : vector<8x16xf32>
    %cst_26 = arith.constant 2.500000e+01 : f32
    %51 = vector.broadcast %cst_26 : f32 to vector<8x16xf32>
    %52 = arith.mulf %51, %21 : vector<8x16xf32>
    %cst_27 = arith.constant 1.000000e+00 : f32
    %53 = vector.broadcast %cst_27 : f32 to vector<8x16xf32>
    %54 = arith.subf %53, %52 : vector<8x16xf32>
    %cst_28 = arith.constant 0.000000e+00 : f32
    %55 = vector.broadcast %cst_28 : f32 to vector<8x16xf32>
    %56 = arith.maximumf %54, %55 : vector<8x16xf32>
    %57 = arith.addf %50, %56 : vector<8x16xf32>
    %cst_29 = arith.constant 3.600000e+01 : f32
    %58 = vector.broadcast %cst_29 : f32 to vector<8x16xf32>
    %59 = arith.mulf %58, %21 : vector<8x16xf32>
    %cst_30 = arith.constant 1.000000e+00 : f32
    %60 = vector.broadcast %cst_30 : f32 to vector<8x16xf32>
    %61 = arith.subf %60, %59 : vector<8x16xf32>
    %cst_31 = arith.constant 0.000000e+00 : f32
    %62 = vector.broadcast %cst_31 : f32 to vector<8x16xf32>
    %63 = arith.maximumf %61, %62 : vector<8x16xf32>
    %64 = arith.addf %57, %63 : vector<8x16xf32>
    %cst_32 = arith.constant 4.900000e+01 : f32
    %65 = vector.broadcast %cst_32 : f32 to vector<8x16xf32>
    %66 = arith.mulf %65, %21 : vector<8x16xf32>
    %cst_33 = arith.constant 1.000000e+00 : f32
    %67 = vector.broadcast %cst_33 : f32 to vector<8x16xf32>
    %68 = arith.subf %67, %66 : vector<8x16xf32>
    %cst_34 = arith.constant 0.000000e+00 : f32
    %69 = vector.broadcast %cst_34 : f32 to vector<8x16xf32>
    %70 = arith.maximumf %68, %69 : vector<8x16xf32>
    %71 = arith.addf %64, %70 : vector<8x16xf32>
    %72 = tpu.reciprocal %71 : vector<8x16xf32> -> vector<8x16xf32>
    %73 = arith.mulf %5, %72 : vector<8x16xf32>
    %c0_35 = arith.constant 0 : index
    %c0_36 = arith.constant 0 : index
    %74 = vector.load %arg6[%c0_35, %c0_36] : memref<16x128xf32, #tpu.memory_space<vmem>>, vector<16x128xf32>
    %cst_37 = arith.constant dense<0.000000e+00> : vector<8x128xf32>
    %75 = tpu.matmul %73, %74, %cst_37 {dimension_numbers = #tpu.dot_dimension_numbers<[1], [0], [0], [1], [0, 0, 1, 1], [], []>} : vector<8x16xf32>, vector<16x128xf32>, vector<8x128xf32> -> vector<8x128xf32>
    %cst_38 = arith.constant dense<0.000000e+00> : vector<8x128xf32>
    %76 = tpu.matmul %21, %74, %cst_38 {dimension_numbers = #tpu.dot_dimension_numbers<[1], [0], [0], [1], [0, 0, 1, 1], [], []>} : vector<8x16xf32>, vector<16x128xf32>, vector<8x128xf32> -> vector<8x128xf32>
    %c0_39 = arith.constant 0 : index
    %c0_40 = arith.constant 0 : index
    %77 = vector.load %arg7[%c0_39, %c0_40] : memref<1x128xf32, #tpu.memory_space<vmem>>, vector<1x128xf32>
    %cst_41 = arith.constant 0.000000e+00 : f32
    %78 = vector.broadcast %cst_41 : f32 to vector<1x128xf32>
    %79 = arith.cmpf oeq, %77, %78 : vector<1x128xf32>
    %80 = vector.broadcast %77 : vector<1x128xf32> to vector<8x128xf32>
    %81 = arith.mulf %80, %76 : vector<8x128xf32>
    %cst_42 = arith.constant 1.000000e+00 : f32
    %82 = vector.broadcast %cst_42 : f32 to vector<8x128xf32>
    %83 = arith.subf %82, %81 : vector<8x128xf32>
    %cst_43 = arith.constant 0.000000e+00 : f32
    %84 = vector.broadcast %cst_43 : f32 to vector<8x128xf32>
    %85 = arith.maximumf %83, %84 : vector<8x128xf32>
    %cst_44 = arith.constant 1.000000e+00 : f32
    %86 = vector.shape_cast %79 : vector<1x128xi1> to vector<1x128xi1>
    %87 = vector.broadcast %86 : vector<1x128xi1> to vector<8x128xi1>
    %88 = vector.broadcast %cst_44 : f32 to vector<8x128xf32>
    %89 = arith.select %87, %88, %85 : vector<8x128xi1>, vector<8x128xf32>
    %90 = arith.mulf %75, %89 : vector<8x128xf32>
    %c0_45 = arith.constant 0 : index
    %c0_46 = arith.constant 0 : index
    %91 = vector.load %arg8[%c0_45, %c0_46] : memref<8x128xf32, #tpu.memory_space<vmem>>, vector<8x128xf32>
    tpu.vector_store %arg8[%c0_45, %c0_46], %90 {strides = array<i32>} : memref<8x128xf32, #tpu.memory_space<vmem>>, vector<8x128xf32>,
    return
  }
  func.func @transform_0(%arg0: i32) -> (i32, i32) {
    %c0_i32 = arith.constant 0 : i32
    %c0_i32_0 = arith.constant 0 : i32
    return %arg0, %c0_i32 : i32, i32
  }
  func.func @transform_1(%arg0: i32) -> (i32, i32) {
    %c0_i32 = arith.constant 0 : i32
    %c0_i32_0 = arith.constant 0 : i32
    %c0_i32_1 = arith.constant 0 : i32
    return %c0_i32, %c0_i32_0 : i32, i32
  }
  func.func @transform_2(%arg0: i32) -> (i32, i32) {
    %c0_i32 = arith.constant 0 : i32
    %c0_i32_0 = arith.constant 0 : i32
    %c0_i32_1 = arith.constant 0 : i32
    return %c0_i32, %c0_i32_0 : i32, i32
  }
  func.func @transform_3(%arg0: i32) -> (i32, i32) {
    %c0_i32 = arith.constant 0 : i32
    %c0_i32_0 = arith.constant 0 : i32
    %c0_i32_1 = arith.constant 0 : i32
    return %c0_i32, %c0_i32_0 : i32, i32
  }
  func.func @transform_4(%arg0: i32) -> (i32, i32) {
    %c0_i32 = arith.constant 0 : i32
    %c0_i32_0 = arith.constant 0 : i32
    %c0_i32_1 = arith.constant 0 : i32
    return %c0_i32, %c0_i32_0 : i32, i32
  }
  func.func @transform_5(%arg0: i32) -> (i32, i32) {
    %c0_i32 = arith.constant 0 : i32
    %c0_i32_0 = arith.constant 0 : i32
    %c0_i32_1 = arith.constant 0 : i32
    return %c0_i32, %c0_i32_0 : i32, i32
  }
  func.func @transform_6(%arg0: i32) -> (i32, i32) {
    %c0_i32 = arith.constant 0 : i32
    %c0_i32_0 = arith.constant 0 : i32
    %c0_i32_1 = arith.constant 0 : i32
    return %c0_i32, %c0_i32_0 : i32, i32
  }
  func.func @transform_7(%arg0: i32) -> (i32, i32) {
    %c0_i32 = arith.constant 0 : i32
    %c0_i32_0 = arith.constant 0 : i32
    return %arg0, %c0_i32 : i32, i32
  }
}

</mosaic_0001>

<bundles_post_ra>
// kernel: tpu_custom_call.1
= control target key start
LH: loop header
LB: loop body
LE: loop exit
PB: predicated region body
PF: predicated region fallthrough
CT: control target
= control target key end

     0   :  { %s2410_s0 = inlined_call_operand.vmem [shape: f32[8,2048], index: 0, kind: input, shape index: {}]   ;;  %s2411_s1 = inlined_call_operand.vmem [shape: f32[2048,16], index: 1, kind: input, shape index: {}]   ;;  %s2412_s2 = inlined_call_operand.vmem [shape: f32[1,16], index: 2, kind: input, shape index: {}]   ;;  %s2413_s3 = inlined_call_operand.vmem [shape: f32[16,16], index: 3, kind: input, shape index: {}]   ;;  %s2414_s4 = inlined_call_operand.vmem [shape: f32[1,16], index: 4, kind: input, shape index: {}]   ;;  %s2415_s5 = inlined_call_operand.vmem [shape: f32[16,128], index: 5, kind: input, shape index: {}]   ;;  %s2416_s6 = inlined_call_operand.vmem [shape: f32[1,128], index: 6, kind: input, shape index: {}]   ;;  %s2417_s7 = inlined_call_operand.hbm [shape: f32[8,128], index: 7, kind: output, shape index: {}]  }
   0x1   :  { %v74_v0 = vld [vmem:[%s2411_s1 + $0xf8] sm:$0xff]  ;;  %v73_v4 = vld [vmem:[%s2411_s1 + $0xf0] sm:$0xff]  ;;  %v72_v8 = vld [vmem:[%s2411_s1 + $0xe8] sm:$0xff] }
   0x2   :  { %v106_v1 = vld [vmem:[%s2411_s1 + $0x1f8] sm:$0xff]  ;;  %1176 = vmatprep.subr.mxu0 %v74_v0  ;;  %v105_v5 = vld [vmem:[%s2411_s1 + $0x1f0] sm:$0xff]  ;;  %v104_v9 = vld [vmem:[%s2411_s1 + $0x1e8] sm:$0xff] }
   0x3   :  { %v58_v2 = vld [vmem:[%s2411_s1 + $0x78] sm:$0xff]  ;;  %1211 = vmatprep.subr.mxu1 %v106_v1  ;;  %v57_v6 = vld [vmem:[%s2411_s1 + $0x70] sm:$0xff]  ;;  %v56_v10 = vld [vmem:[%s2411_s1 + $0x68] sm:$0xff] }
   0x4   :  { %v90_v3 = vld [vmem:[%s2411_s1 + $0x178] sm:$0xff]  ;;  %1177 = vmatpush3.msra.mxu0 %v58_v2  ;;  %v89_v7 = vld [vmem:[%s2411_s1 + $0x170] sm:$0xff]  ;;  %v88_v11 = vld [vmem:[%s2411_s1 + $0x168] sm:$0xff] }
   0x5   :  { %1212 = vmatpush3.msra.mxu1 %v90_v3  ;;  %1178 = vmatprep.subr.mxu0 %v73_v4  ;;  %v71_v12 = vld [vmem:[%s2411_s1 + $0xe0] sm:$0xff]  ;;  %v70_v16 = vld [vmem:[%s2411_s1 + $0xd8] sm:$0xff]  ;;  %v69_v20 = vld [vmem:[%s2411_s1 + $0xd0] sm:$0xff] }
   0x6   :  { %1213 = vmatprep.subr.mxu1 %v105_v5  ;;  %1179 = vmatpush3.msra.mxu0 %v57_v6  ;;  %v103_v13 = vld [vmem:[%s2411_s1 + $0x1e0] sm:$0xff]  ;;  %v102_v17 = vld [vmem:[%s2411_s1 + $0x1d8] sm:$0xff]  ;;  %v101_v21 = vld [vmem:[%s2411_s1 + $0x1d0] sm:$0xff] }
   0x7   :  { %1214 = vmatpush3.msra.mxu1 %v89_v7  ;;  %1180 = vmatprep.subr.mxu0 %v72_v8  ;;  %v55_v14 = vld [vmem:[%s2411_s1 + $0x60] sm:$0xff]  ;;  %v54_v18 = vld [vmem:[%s2411_s1 + $0x58] sm:$0xff]  ;;  %v53_v22 = vld [vmem:[%s2411_s1 + $0x50] sm:$0xff] }
   0x8   :  { %1215 = vmatprep.subr.mxu1 %v104_v9  ;;  %v87_v15 = vld [vmem:[%s2411_s1 + $0x160] sm:$0xff]  ;;  %1181 = vmatpush3.msra.mxu0 %v56_v10  ;;  %v86_v19 = vld [vmem:[%s2411_s1 + $0x158] sm:$0xff]  ;;  %v85_v23 = vld [vmem:[%s2411_s1 + $0x150] sm:$0xff] }
   0x9   :  { %1216 = vmatpush3.msra.mxu1 %v88_v11  ;;  %1182 = vmatprep.subr.mxu0 %v71_v12  ;;  %v68_v24 = vld [vmem:[%s2411_s1 + $0xc8] sm:$0xff]  ;;  %v67_v28 = vld [vmem:[%s2411_s1 + $0xc0] sm:$0xff]  ;;  %v66_v32 = vld [vmem:[%s2411_s1 + $0xb8] sm:$0xff] }
   0xa   :  { %1217 = vmatprep.subr.mxu1 %v103_v13  ;;  %1183 = vmatpush3.msra.mxu0 %v55_v14  ;;  %v100_v25 = vld [vmem:[%s2411_s1 + $0x1c8] sm:$0xff]  ;;  %v99_v29 = vld [vmem:[%s2411_s1 + $0x1c0] sm:$0xff]  ;;  %v98_v33 = vld [vmem:[%s2411_s1 + $0x1b8] sm:$0xff] }
   0xb   :  { %1218 = vmatpush3.msra.mxu1 %v87_v15  ;;  %1184 = vmatprep.subr.mxu0 %v70_v16  ;;  %v52_v26 = vld [vmem:[%s2411_s1 + $0x48] sm:$0xff]  ;;  %v51_v30 = vld [vmem:[%s2411_s1 + $0x40] sm:$0xff]  ;;  %v50_v34 = vld [vmem:[%s2411_s1 + $0x38] sm:$0xff] }
   0xc   :  { %1219 = vmatprep.subr.mxu1 %v102_v17  ;;  %1185 = vmatpush3.msra.mxu0 %v54_v18  ;;  %v84_v27 = vld [vmem:[%s2411_s1 + $0x148] sm:$0xff]  ;;  %v83_v31 = vld [vmem:[%s2411_s1 + $0x140] sm:$0xff]  ;;  %v82_v35 = vld [vmem:[%s2411_s1 + $0x138] sm:$0xff] }
   0xd   :  { %1220 = vmatpush3.msra.mxu1 %v86_v19  ;;  %1186 = vmatprep.subr.mxu0 %v69_v20  ;;  %v65_v36 = vld [vmem:[%s2411_s1 + $0xb0] sm:$0xff]  ;;  %v64_v40 = vld [vmem:[%s2411_s1 + $0xa8] sm:$0xff]  ;;  %v63_v44 = vld [vmem:[%s2411_s1 + $0xa0] sm:$0xff] }
   0xe   :  { %1221 = vmatprep.subr.mxu1 %v101_v21  ;;  %1187 = vmatpush3.msra.mxu0 %v53_v22  ;;  %v97_v37 = vld [vmem:[%s2411_s1 + $0x1b0] sm:$0xff]  ;;  %v96_v41 = vld [vmem:[%s2411_s1 + $0x1a8] sm:$0xff]  ;;  %v95_v45 = vld [vmem:[%s2411_s1 + $0x1a0] sm:$0xff] }
   0xf   :  { %1222 = vmatpush3.msra.mxu1 %v85_v23  ;;  %1188 = vmatprep.subr.mxu0 %v68_v24  ;;  %v49_v38 = vld [vmem:[%s2411_s1 + $0x30] sm:$0xff]  ;;  %v48_v42 = vld [vmem:[%s2411_s1 + $0x28] sm:$0xff]  ;;  %v47_v46 = vld [vmem:[%s2411_s1 + $0x20] sm:$0xff] }
  0x10   :  { %1223 = vmatprep.subr.mxu1 %v100_v25  ;;  %1189 = vmatpush3.msra.mxu0 %v52_v26  ;;  %v81_v39 = vld [vmem:[%s2411_s1 + $0x130] sm:$0xff]  ;;  %v80_v43 = vld [vmem:[%s2411_s1 + $0x128] sm:$0xff]  ;;  %v79_v47 = vld [vmem:[%s2411_s1 + $0x120] sm:$0xff] }
  0x11   :  { %1224 = vmatpush3.msra.mxu1 %v84_v27  ;;  %1190 = vmatprep.subr.mxu0 %v67_v28  ;;  %v62_v48 = vld [vmem:[%s2411_s1 + $0x98] sm:$0xff]  ;;  %v61_v52 = vld [vmem:[%s2411_s1 + $0x90] sm:$0xff]  ;;  %v60_v56 = vld [vmem:[%s2411_s1 + $0x88] sm:$0xff] }
  0x12   :  { %1225 = vmatprep.subr.mxu1 %v99_v29  ;;  %1191 = vmatpush3.msra.mxu0 %v51_v30  ;;  %v94_v49 = vld [vmem:[%s2411_s1 + $0x198] sm:$0xff]  ;;  %v93_v53 = vld [vmem:[%s2411_s1 + $0x190] sm:$0xff]  ;;  %v92_v57 = vld [vmem:[%s2411_s1 + $0x188] sm:$0xff] }
  0x13   :  { %1226 = vmatpush3.msra.mxu1 %v83_v31  ;;  %1192 = vmatprep.subr.mxu0 %v66_v32  ;;  %v46_v50 = vld [vmem:[%s2411_s1 + $0x18] sm:$0xff]  ;;  %v45_v54 = vld [vmem:[%s2411_s1 + $0x10] sm:$0xff]  ;;  %v44_v58 = vld [vmem:[%s2411_s1 + $0x8] sm:$0xff] }
  0x14   :  { %1227 = vmatprep.subr.mxu1 %v98_v33  ;;  %1193 = vmatpush3.msra.mxu0 %v50_v34  ;;  %v78_v51 = vld [vmem:[%s2411_s1 + $0x118] sm:$0xff]  ;;  %v77_v55 = vld [vmem:[%s2411_s1 + $0x110] sm:$0xff]  ;;  %v76_v59 = vld [vmem:[%s2411_s1 + $0x108] sm:$0xff] }
  0x15   :  { %1228 = vmatpush3.msra.mxu1 %v82_v35  ;;  %1194 = vmatprep.subr.mxu0 %v65_v36  ;;  %v59_v60 = vld [vmem:[%s2411_s1 + $0x80] sm:$0xff]  ;;  %v28_v63 = vld [vmem:[%s2410_s0 + $0x8] sm:$0xff]  ;;  %v30_v2 = vld [vmem:[%s2410_s0 + $0x18] sm:$0xff] }
  0x16   :  { %1229 = vmatprep.subr.mxu1 %v97_v37  ;;  %1195 = vmatpush3.msra.mxu0 %v49_v38  ;;  %v91_v61 = vld [vmem:[%s2411_s1 + $0x180] sm:$0xff]  ;;  %v138_v3 = vld [vmem:[%s2411_s1 + $0x2f8] sm:$0xff]  ;;  %v29_v5 = vld [vmem:[%s2410_s0 + $0x10] sm:$0xff] }
  0x17   :  { %1230 = vmatpush3.msra.mxu1 %v81_v39  ;;  %1196 = vmatprep.subr.mxu0 %v64_v40  ;;  %v43_v62 = vld [vmem:[%s2411_s1] sm:$0xff]  ;;  %v170_v4 = vld [vmem:[%s2411_s1 + $0x3f8] sm:$0xff]  ;;  %v137_v8 = vld [vmem:[%s2411_s1 + $0x2f0] sm:$0xff] }
  0x18   :  { %1231 = vmatprep.subr.mxu1 %v96_v41  ;;  %1197 = vmatpush3.msra.mxu0 %v48_v42  ;;  %v75_v0 = vld [vmem:[%s2411_s1 + $0x100] sm:$0xff]  ;;  %v122_v6 = vld [vmem:[%s2411_s1 + $0x278] sm:$0xff]  ;;  %v169_v9 = vld [vmem:[%s2411_s1 + $0x3f0] sm:$0xff] }
  0x19   :  { %1232 = vmatpush3.msra.mxu1 %v80_v43  ;;  %1198 = vmatprep.subr.mxu0 %v63_v44  ;;  %v27_v1 = vld [vmem:[%s2410_s0] sm:$0xff]  ;;  %v154_v7 = vld [vmem:[%s2411_s1 + $0x378] sm:$0xff]  ;;  %v121_v10 = vld [vmem:[%s2411_s1 + $0x270] sm:$0xff] }
  0x1a   :  { %1233 = vmatprep.subr.mxu1 %v95_v45  ;;  %1199 = vmatpush3.msra.mxu0 %v47_v46  ;;  %v153_v11 = vld [vmem:[%s2411_s1 + $0x370] sm:$0xff]  ;;  %v136_v12 = vld [vmem:[%s2411_s1 + $0x2e8] sm:$0xff]  ;;  %v135_v16 = vld [vmem:[%s2411_s1 + $0x2e0] sm:$0xff] }
  0x1b   :  { %1234 = vmatpush3.msra.mxu1 %v79_v47  ;;  %1200 = vmatprep.subr.mxu0 %v62_v48  ;;  %v168_v13 = vld [vmem:[%s2411_s1 + $0x3e8] sm:$0xff]  ;;  %v167_v17 = vld [vmem:[%s2411_s1 + $0x3e0] sm:$0xff]  ;;  %v134_v20 = vld [vmem:[%s2411_s1 + $0x2d8] sm:$0xff] }
  0x1c   :  { %1235 = vmatprep.subr.mxu1 %v94_v49  ;;  %1201 = vmatpush3.msra.mxu0 %v46_v50  ;;  %v120_v14 = vld [vmem:[%s2411_s1 + $0x268] sm:$0xff]  ;;  %v119_v18 = vld [vmem:[%s2411_s1 + $0x260] sm:$0xff]  ;;  %v166_v21 = vld [vmem:[%s2411_s1 + $0x3d8] sm:$0xff] }
  0x1d   :  { %1236 = vmatpush3.msra.mxu1 %v78_v51  ;;  %1202 = vmatprep.subr.mxu0 %v61_v52  ;;  %v152_v15 = vld [vmem:[%s2411_s1 + $0x368] sm:$0xff]  ;;  %v151_v19 = vld [vmem:[%s2411_s1 + $0x360] sm:$0xff]  ;;  %v118_v22 = vld [vmem:[%s2411_s1 + $0x258] sm:$0xff] }
  0x1e   :  { %1237 = vmatprep.subr.mxu1 %v93_v53  ;;  %1203 = vmatpush3.msra.mxu0 %v45_v54  ;;  %v150_v23 = vld [vmem:[%s2411_s1 + $0x358] sm:$0xff]  ;;  %v133_v24 = vld [vmem:[%s2411_s1 + $0x2d0] sm:$0xff]  ;;  %v132_v28 = vld [vmem:[%s2411_s1 + $0x2c8] sm:$0xff] }
  0x1f   :  { %1238 = vmatpush3.msra.mxu1 %v77_v55  ;;  %1204 = vmatprep.subr.mxu0 %v60_v56  ;;  %v165_v25 = vld [vmem:[%s2411_s1 + $0x3d0] sm:$0xff]  ;;  %v164_v29 = vld [vmem:[%s2411_s1 + $0x3c8] sm:$0xff]  ;;  %v131_v32 = vld [vmem:[%s2411_s1 + $0x2c0] sm:$0xff] }
  0x20   :  { %1239 = vmatprep.subr.mxu1 %v92_v57  ;;  %1205 = vmatpush3.msra.mxu0 %v44_v58  ;;  %v117_v26 = vld [vmem:[%s2411_s1 + $0x250] sm:$0xff]  ;;  %v116_v30 = vld [vmem:[%s2411_s1 + $0x248] sm:$0xff]  ;;  %v163_v33 = vld [vmem:[%s2411_s1 + $0x3c0] sm:$0xff] }
  0x21   :  { %1240 = vmatpush3.msra.mxu1 %v76_v59  ;;  %1206 = vmatprep.subr.mxu0 %v59_v60  ;;  %v149_v27 = vld [vmem:[%s2411_s1 + $0x350] sm:$0xff]  ;;  %v148_v31 = vld [vmem:[%s2411_s1 + $0x348] sm:$0xff]  ;;  %v115_v34 = vld [vmem:[%s2411_s1 + $0x240] sm:$0xff] }
  0x22   :  { %1241 = vmatprep.subr.mxu1 %v91_v61  ;;  %1207 = vmatpush3.msra.mxu0 %v43_v62  ;;  %v147_v35 = vld [vmem:[%s2411_s1 + $0x340] sm:$0xff]  ;;  %v130_v36 = vld [vmem:[%s2411_s1 + $0x2b8] sm:$0xff]  ;;  %v129_v40 = vld [vmem:[%s2411_s1 + $0x2b0] sm:$0xff] }
  0x23   :  { %370 = vmatprep.mubr.f32.mxu0 %v28_v63  ;;  %1242 = vmatpush3.msra.mxu1 %v75_v0  ;;  %v162_v37 = vld [vmem:[%s2411_s1 + $0x3b8] sm:$0xff]  ;;  %v161_v41 = vld [vmem:[%s2411_s1 + $0x3b0] sm:$0xff]  ;;  %v128_v44 = vld [vmem:[%s2411_s1 + $0x2a8] sm:$0xff] }
  0x24   :  { %371 = vmatmul.mubr.f32.vlgmr.msra.gmra.mxu0 %v27_v1  ;;  %440 = vmatprep.mubr.f32.mxu1 %v30_v2  ;;  %v114_v38 = vld [vmem:[%s2411_s1 + $0x238] sm:$0xff]  ;;  %v113_v42 = vld [vmem:[%s2411_s1 + $0x230] sm:$0xff]  ;;  %v160_v45 = vld [vmem:[%s2411_s1 + $0x3a8] sm:$0xff] }
  0x25   :  { %1246 = vmatprep.subr.mxu0 %v138_v3  ;;  %1281 = vmatprep.subr.mxu1 %v170_v4  ;;  %v146_v39 = vld [vmem:[%s2411_s1 + $0x338] sm:$0xff]  ;;  %v145_v43 = vld [vmem:[%s2411_s1 + $0x330] sm:$0xff]  ;;  %v112_v46 = vld [vmem:[%s2411_s1 + $0x228] sm:$0xff] }
  0x26   :  { %441 = vmatmul.mubr.f32.vlgmr.msra.gmra.mxu1 %v29_v5  ;;  %1247 = vmatpush3.msra.mxu0 %v122_v6  ;;  %v144_v47 = vld [vmem:[%s2411_s1 + $0x328] sm:$0xff]  ;;  %v127_v48 = vld [vmem:[%s2411_s1 + $0x2a0] sm:$0xff]  ;;  %v126_v52 = vld [vmem:[%s2411_s1 + $0x298] sm:$0xff] }
  0x27   :  { %1282 = vmatpush3.msra.mxu1 %v154_v7  ;;  %1248 = vmatprep.subr.mxu0 %v137_v8  ;;  %v159_v49 = vld [vmem:[%s2411_s1 + $0x3a0] sm:$0xff]  ;;  %v158_v53 = vld [vmem:[%s2411_s1 + $0x398] sm:$0xff]  ;;  %v125_v56 = vld [vmem:[%s2411_s1 + $0x290] sm:$0xff] }
  0x28   :  { %1283 = vmatprep.subr.mxu1 %v169_v9  ;;  %1249 = vmatpush3.msra.mxu0 %v121_v10  ;;  %v111_v50 = vld [vmem:[%s2411_s1 + $0x220] sm:$0xff]  ;;  %v110_v54 = vld [vmem:[%s2411_s1 + $0x218] sm:$0xff]  ;;  %v157_v57 = vld [vmem:[%s2411_s1 + $0x390] sm:$0xff] }
  0x29   :  { %1284 = vmatpush3.msra.mxu1 %v153_v11  ;;  %1250 = vmatprep.subr.mxu0 %v136_v12  ;;  %v143_v51 = vld [vmem:[%s2411_s1 + $0x320] sm:$0xff]  ;;  %v142_v55 = vld [vmem:[%s2411_s1 + $0x318] sm:$0xff]  ;;  %v109_v58 = vld [vmem:[%s2411_s1 + $0x210] sm:$0xff] }
  0x2a   :  { %1285 = vmatprep.subr.mxu1 %v168_v13  ;;  %1251 = vmatpush3.msra.mxu0 %v120_v14  ;;  %v141_v59 = vld [vmem:[%s2411_s1 + $0x310] sm:$0xff]  ;;  %v124_v60 = vld [vmem:[%s2411_s1 + $0x288] sm:$0xff]  ;;  %v123_v0 = vld [vmem:[%s2411_s1 + $0x280] sm:$0xff] }
  0x2b   :  { %1286 = vmatpush3.msra.mxu1 %v152_v15  ;;  %1252 = vmatprep.subr.mxu0 %v135_v16  ;;  %v156_v61 = vld [vmem:[%s2411_s1 + $0x388] sm:$0xff]  ;;  %v155_v1 = vld [vmem:[%s2411_s1 + $0x380] sm:$0xff]  ;;  %v34_v6 = vld [vmem:[%s2410_s0 + $0x38] sm:$0xff] }
  0x2c   :  { %1287 = vmatprep.subr.mxu1 %v167_v17  ;;  %1253 = vmatpush3.msra.mxu0 %v119_v18  ;;  %v108_v62 = vld [vmem:[%s2411_s1 + $0x208] sm:$0xff]  ;;  %v107_v2 = vld [vmem:[%s2411_s1 + $0x200] sm:$0xff]  ;;  %v202_v7 = vld [vmem:[%s2411_s1 + $0x4f8] sm:$0xff] }
  0x2d   :  { %1288 = vmatpush3.msra.mxu1 %v151_v19  ;;  %1254 = vmatprep.subr.mxu0 %v134_v20  ;;  %v140_v63 = vld [vmem:[%s2411_s1 + $0x308] sm:$0xff]  ;;  %v139_v4 = vld [vmem:[%s2411_s1 + $0x300] sm:$0xff]  ;;  %v234_v8 = vld [vmem:[%s2411_s1 + $0x5f8] sm:$0xff] }
  0x2e   :  { %1289 = vmatprep.subr.mxu1 %v166_v21  ;;  %1255 = vmatpush3.msra.mxu0 %v118_v22  ;;  %v32_v3 = vld [vmem:[%s2410_s0 + $0x28] sm:$0xff]  ;;  %v31_v5 = vld [vmem:[%s2410_s0 + $0x20] sm:$0xff]  ;;  %v33_v9 = vld [vmem:[%s2410_s0 + $0x30] sm:$0xff] }
  0x2f   :  { %1290 = vmatpush3.msra.mxu1 %v150_v23  ;;  %1256 = vmatprep.subr.mxu0 %v133_v24  ;;  %v186_v10 = vld [vmem:[%s2411_s1 + $0x478] sm:$0xff]  ;;  %v201_v12 = vld [vmem:[%s2411_s1 + $0x4f0] sm:$0xff]  ;;  %v200_v16 = vld [vmem:[%s2411_s1 + $0x4e8] sm:$0xff] }
  0x30   :  { %1291 = vmatprep.subr.mxu1 %v165_v25  ;;  %1257 = vmatpush3.msra.mxu0 %v117_v26  ;;  %v218_v11 = vld [vmem:[%s2411_s1 + $0x578] sm:$0xff]  ;;  %v233_v13 = vld [vmem:[%s2411_s1 + $0x5f0] sm:$0xff]  ;;  %v232_v17 = vld [vmem:[%s2411_s1 + $0x5e8] sm:$0xff] }
  0x31   :  { %1292 = vmatpush3.msra.mxu1 %v149_v27  ;;  %1258 = vmatprep.subr.mxu0 %v132_v28  ;;  %v185_v14 = vld [vmem:[%s2411_s1 + $0x470] sm:$0xff]  ;;  %v184_v18 = vld [vmem:[%s2411_s1 + $0x468] sm:$0xff]  ;;  %v199_v20 = vld [vmem:[%s2411_s1 + $0x4e0] sm:$0xff] }
  0x32   :  { %1293 = vmatprep.subr.mxu1 %v164_v29  ;;  %1259 = vmatpush3.msra.mxu0 %v116_v30  ;;  %v217_v15 = vld [vmem:[%s2411_s1 + $0x570] sm:$0xff]  ;;  %v216_v19 = vld [vmem:[%s2411_s1 + $0x568] sm:$0xff]  ;;  %v231_v21 = vld [vmem:[%s2411_s1 + $0x5e0] sm:$0xff] }
  0x33   :  { %1294 = vmatpush3.msra.mxu1 %v148_v31  ;;  %1260 = vmatprep.subr.mxu0 %v131_v32  ;;  %v183_v22 = vld [vmem:[%s2411_s1 + $0x460] sm:$0xff]  ;;  %v198_v24 = vld [vmem:[%s2411_s1 + $0x4d8] sm:$0xff]  ;;  %v197_v28 = vld [vmem:[%s2411_s1 + $0x4d0] sm:$0xff] }
  0x34   :  { %1295 = vmatprep.subr.mxu1 %v163_v33  ;;  %1261 = vmatpush3.msra.mxu0 %v115_v34  ;;  %v215_v23 = vld [vmem:[%s2411_s1 + $0x560] sm:$0xff]  ;;  %v230_v25 = vld [vmem:[%s2411_s1 + $0x5d8] sm:$0xff]  ;;  %v229_v29 = vld [vmem:[%s2411_s1 + $0x5d0] sm:$0xff] }
  0x35   :  { %1296 = vmatpush3.msra.mxu1 %v147_v35  ;;  %1262 = vmatprep.subr.mxu0 %v130_v36  ;;  %v182_v26 = vld [vmem:[%s2411_s1 + $0x458] sm:$0xff]  ;;  %v181_v30 = vld [vmem:[%s2411_s1 + $0x450] sm:$0xff]  ;;  %v196_v32 = vld [vmem:[%s2411_s1 + $0x4c8] sm:$0xff] }
  0x36   :  { %1297 = vmatprep.subr.mxu1 %v162_v37  ;;  %1263 = vmatpush3.msra.mxu0 %v114_v38  ;;  %v214_v27 = vld [vmem:[%s2411_s1 + $0x558] sm:$0xff]  ;;  %v213_v31 = vld [vmem:[%s2411_s1 + $0x550] sm:$0xff]  ;;  %v228_v33 = vld [vmem:[%s2411_s1 + $0x5c8] sm:$0xff] }
  0x37   :  { %1298 = vmatpush3.msra.mxu1 %v146_v39  ;;  %1264 = vmatprep.subr.mxu0 %v129_v40  ;;  %v180_v34 = vld [vmem:[%s2411_s1 + $0x448] sm:$0xff]  ;;  %v195_v36 = vld [vmem:[%s2411_s1 + $0x4c0] sm:$0xff]  ;;  %v194_v40 = vld [vmem:[%s2411_s1 + $0x4b8] sm:$0xff] }
  0x38   :  { %1299 = vmatprep.subr.mxu1 %v161_v41  ;;  %1265 = vmatpush3.msra.mxu0 %v113_v42  ;;  %v212_v35 = vld [vmem:[%s2411_s1 + $0x548] sm:$0xff]  ;;  %v227_v37 = vld [vmem:[%s2411_s1 + $0x5c0] sm:$0xff]  ;;  %v226_v41 = vld [vmem:[%s2411_s1 + $0x5b8] sm:$0xff] }
  0x39   :  { %1300 = vmatpush3.msra.mxu1 %v145_v43  ;;  %1266 = vmatprep.subr.mxu0 %v128_v44  ;;  %v179_v38 = vld [vmem:[%s2411_s1 + $0x440] sm:$0xff]  ;;  %v178_v42 = vld [vmem:[%s2411_s1 + $0x438] sm:$0xff]  ;;  %v193_v44 = vld [vmem:[%s2411_s1 + $0x4b0] sm:$0xff] }
  0x3a   :  { %1301 = vmatprep.subr.mxu1 %v160_v45  ;;  %1267 = vmatpush3.msra.mxu0 %v112_v46  ;;  %v211_v39 = vld [vmem:[%s2411_s1 + $0x540] sm:$0xff]  ;;  %v210_v43 = vld [vmem:[%s2411_s1 + $0x538] sm:$0xff]  ;;  %v225_v45 = vld [vmem:[%s2411_s1 + $0x5b0] sm:$0xff] }
  0x3b   :  { %1302 = vmatpush3.msra.mxu1 %v144_v47  ;;  %1268 = vmatprep.subr.mxu0 %v127_v48  ;;  %v177_v46 = vld [vmem:[%s2411_s1 + $0x430] sm:$0xff]  ;;  %v192_v48 = vld [vmem:[%s2411_s1 + $0x4a8] sm:$0xff] }
  0x3c   :  { %1303 = vmatprep.subr.mxu1 %v159_v49  ;;  %1269 = vmatpush3.msra.mxu0 %v111_v50  ;;  %v209_v47 = vld [vmem:[%s2411_s1 + $0x530] sm:$0xff]  ;;  %v224_v49 = vld [vmem:[%s2411_s1 + $0x5a8] sm:$0xff] }
  0x3d   :  { %1304 = vmatpush3.msra.mxu1 %v143_v51  ;;  %1270 = vmatprep.subr.mxu0 %v126_v52  ;;  %v176_v50 = vld [vmem:[%s2411_s1 + $0x428] sm:$0xff]  ;;  %v191_v52 = vld [vmem:[%s2411_s1 + $0x4a0] sm:$0xff] }
  0x3e   :  { %1305 = vmatprep.subr.mxu1 %v158_v53  ;;  %1271 = vmatpush3.msra.mxu0 %v110_v54  ;;  %v208_v51 = vld [vmem:[%s2411_s1 + $0x528] sm:$0xff]  ;;  %v223_v53 = vld [vmem:[%s2411_s1 + $0x5a0] sm:$0xff] }
  0x3f   :  { %1306 = vmatpush3.msra.mxu1 %v142_v55  ;;  %1272 = vmatprep.subr.mxu0 %v125_v56  ;;  %v175_v54 = vld [vmem:[%s2411_s1 + $0x420] sm:$0xff]  ;;  %v190_v56 = vld [vmem:[%s2411_s1 + $0x498] sm:$0xff] }
  0x40   :  { %1307 = vmatprep.subr.mxu1 %v157_v57  ;;  %1273 = vmatpush3.msra.mxu0 %v109_v58  ;;  %v207_v55 = vld [vmem:[%s2411_s1 + $0x520] sm:$0xff]  ;;  %v222_v57 = vld [vmem:[%s2411_s1 + $0x598] sm:$0xff] }
  0x41   :  { %1308 = vmatpush3.msra.mxu1 %v141_v59  ;;  %1274 = vmatprep.subr.mxu0 %v124_v60 }
  0x42   :  { %1309 = vmatprep.subr.mxu1 %v156_v61  ;;  %1275 = vmatpush3.msra.mxu0 %v108_v62 }
  0x43   :  { %1310 = vmatpush3.msra.mxu1 %v140_v63  ;;  %1276 = vmatprep.subr.mxu0 %v123_v0 }
  0x44   :  { %1311 = vmatprep.subr.mxu1 %v155_v1  ;;  %1277 = vmatpush3.msra.mxu0 %v107_v2 }
  0x45   :  { %510 = vmatprep.mubr.f32.mxu0 %v32_v3  ;;  %1312 = vmatpush3.msra.mxu1 %v139_v4 }
  0x46   :  { %511 = vmatmul.mubr.f32.vlgmr.msra.gmra.mxu0 %v31_v5  ;;  %580 = vmatprep.mubr.f32.mxu1 %v34_v6 }
  0x47   :  { %1316 = vmatprep.subr.mxu0 %v202_v7  ;;  %1351 = vmatprep.subr.mxu1 %v234_v8 }
  0x48   :  { %581 = vmatmul.mubr.f32.vlgmr.msra.gmra.mxu1 %v33_v9  ;;  %1317 = vmatpush3.msra.mxu0 %v186_v10 }
  0x49   :  { %1352 = vmatpush3.msra.mxu1 %v218_v11  ;;  %1318 = vmatprep.subr.mxu0 %v201_v12 }
  0x4a   :  { %1353 = vmatprep.subr.mxu1 %v233_v13  ;;  %1319 = vmatpush3.msra.mxu0 %v185_v14 }
  0x4b   :  { %1354 = vmatpush3.msra.mxu1 %v217_v15  ;;  %1320 = vmatprep.subr.mxu0 %v200_v16 }
  0x4c   :  { %1355 = vmatprep.subr.mxu1 %v232_v17  ;;  %1321 = vmatpush3.msra.mxu0 %v184_v18 }
  0x4d   :  { %1356 = vmatpush3.msra.mxu1 %v216_v19  ;;  %1322 = vmatprep.subr.mxu0 %v199_v20 }
  0x4e   :  { %1357 = vmatprep.subr.mxu1 %v231_v21  ;;  %1323 = vmatpush3.msra.mxu0 %v183_v22 }
  0x4f   :  { %1358 = vmatpush3.msra.mxu1 %v215_v23  ;;  %1324 = vmatprep.subr.mxu0 %v198_v24 }
  0x50   :  { %1359 = vmatprep.subr.mxu1 %v230_v25  ;;  %1325 = vmatpush3.msra.mxu0 %v182_v26 }
  0x51   :  { %1360 = vmatpush3.msra.mxu1 %v214_v27  ;;  %1326 = vmatprep.subr.mxu0 %v197_v28 }
  0x52   :  { %1361 = vmatprep.subr.mxu1 %v229_v29  ;;  %1327 = vmatpush3.msra.mxu0 %v181_v30 }
  0x53   :  { %1362 = vmatpush3.msra.mxu1 %v213_v31  ;;  %1328 = vmatprep.subr.mxu0 %v196_v32 }
  0x54   :  { %1363 = vmatprep.subr.mxu1 %v228_v33  ;;  %1329 = vmatpush3.msra.mxu0 %v180_v34 }
  0x55   :  { %1364 = vmatpush3.msra.mxu1 %v212_v35  ;;  %1330 = vmatprep.subr.mxu0 %v195_v36 }
  0x56   :  { %1365 = vmatprep.subr.mxu1 %v227_v37  ;;  %1331 = vmatpush3.msra.mxu0 %v179_v38 }
  0x57   :  { %1366 = vmatpush3.msra.mxu1 %v211_v39  ;;  %1332 = vmatprep.subr.mxu0 %v194_v40 }
  0x58   :  { %1367 = vmatprep.subr.mxu1 %v226_v41  ;;  %1333 = vmatpush3.msra.mxu0 %v178_v42 }
  0x59   :  { %1368 = vmatpush3.msra.mxu1 %v210_v43  ;;  %1334 = vmatprep.subr.mxu0 %v193_v44 }
  0x5a   :  { %1369 = vmatprep.subr.mxu1 %v225_v45  ;;  %1335 = vmatpush3.msra.mxu0 %v177_v46 }
  0x5b   :  { %1370 = vmatpush3.msra.mxu1 %v209_v47  ;;  %1336 = vmatprep.subr.mxu0 %v192_v48 }
  0x5c   :  { %1371 = vmatprep.subr.mxu1 %v224_v49  ;;  %1337 = vmatpush3.msra.mxu0 %v176_v50 }
  0x5d   :  { %1372 = vmatpush3.msra.mxu1 %v208_v51 }
  0x5e   :  { %12 = vsyncpa [#allocation3], 0  ;;  %1338 = vmatprep.subr.mxu0 %v191_v52  ;;  %1373 = vmatprep.subr.mxu1 %v223_v53  ;;  %v174_v58 = vld [vmem:[%s2411_s1 + $0x418] sm:$0xff]  ;;  %v189_v60 = vld [vmem:[%s2411_s1 + $0x490] sm:$0xff]  ;;  %vm1521_vm0 = vmmov 0   ;;  %vm875_vm1 = vcmask 130048  }
  0x5f   :  { %v206_v59 = vld [vmem:[%s2411_s1 + $0x518] sm:$0xff]  ;;  %1339 = vmatpush3.msra.mxu0 %v175_v54  ;;  %1374 = vmatpush3.msra.mxu1 %v207_v55  ;;  %v221_v61 = vld [vmem:[%s2411_s1 + $0x590] sm:$0xff]  ;;  %v188_v0 = vld [vmem:[%s2411_s1 + $0x488] sm:$0xff]  ;;  %s1523_s24 = smov [#allocation2]  }
  0x60   :  { %1340 = vmatprep.subr.mxu0 %v190_v56  ;;  %1375 = vmatprep.subr.mxu1 %v222_v57  ;;  %v173_v62 = vld [vmem:[%s2411_s1 + $0x410] sm:$0xff]  ;;  %v220_v1 = vld [vmem:[%s2411_s1 + $0x588] sm:$0xff]  ;;  %v187_v4 = vld [vmem:[%s2411_s1 + $0x480] sm:$0xff]  ;;  %s1162_s25 = sshll.u32 %s1523_s24, 4  ;;  %s1163_s25 = int_to_ptr.vmem [resolvable:$true] %s1162_s25 }
  0x61   :  { %v205_v63 = vld [vmem:[%s2411_s1 + $0x510] sm:$0xff]  ;;  %1341 = vmatpush3.msra.mxu0 %v174_v58  ;;  %1376 = vmatpush3.msra.mxu1 %v206_v59  ;;  %v172_v2 = vld [vmem:[%s2411_s1 + $0x408] sm:$0xff]  ;;  %v219_v5 = vld [vmem:[%s2411_s1 + $0x580] sm:$0xff]  ;;  %s1498_s26 = scalar_lea.vmem %s1163_s25, 128  ;;  %p1503_p1 = scmp.lt.s32.totalorder %s1163_s25, %s1163_s25 }
  0x62   :  { %1342 = vmatprep.subr.mxu0 %v189_v60  ;;  %1377 = vmatprep.subr.mxu1 %v221_v61  ;;  %v204_v3 = vld [vmem:[%s2411_s1 + $0x508] sm:$0xff]  ;;  %v171_v6 = vld [vmem:[%s2411_s1 + $0x400] sm:$0xff]  ;;  %v38_v10 = vld [vmem:[%s2410_s0 + $0x58] sm:$0xff]  ;;  %p1499_p0 = scmp.ne.s32.totalorder %s1163_s25, %s1498_s26  ;;  %p1504_p2 = scmp.lt.s32.totalorder %s1498_s26, %s1498_s26 }
  0x63   :  { %1343 = vmatpush3.msra.mxu0 %v173_v62  ;;  %1378 = vmatpush3.msra.mxu1 %v205_v63  ;;  %v36_v7 = vld [vmem:[%s2410_s0 + $0x48] sm:$0xff]  ;;  %v203_v8 = vld [vmem:[%s2411_s1 + $0x500] sm:$0xff]  ;;  %v266_v11 = vld [vmem:[%s2411_s1 + $0x6f8] sm:$0xff] }
  0x64   :  { %1344 = vmatprep.subr.mxu0 %v188_v0  ;;  %1379 = vmatprep.subr.mxu1 %v220_v1  ;;  %v35_v9 = vld [vmem:[%s2410_s0 + $0x40] sm:$0xff]  ;;  %v298_v12 = vld [vmem:[%s2411_s1 + $0x7f8] sm:$0xff]  ;;  %v37_v13 = vld [vmem:[%s2410_s0 + $0x50] sm:$0xff]  ;;  %p1505_p3 = por %p1504_p2, %p1503_p1 }
  0x65   :  { %1345 = vmatpush3.msra.mxu0 %v172_v2  ;;  %1380 = vmatpush3.msra.mxu1 %v204_v3  ;;  %v250_v14 = vld [vmem:[%s2411_s1 + $0x678] sm:$0xff]  ;;  %v265_v16 = vld [vmem:[%s2411_s1 + $0x6f0] sm:$0xff]  ;;  %v264_v20 = vld [vmem:[%s2411_s1 + $0x6e8] sm:$0xff] }
  0x66   :  { %1346 = vmatprep.subr.mxu0 %v187_v4  ;;  %1381 = vmatprep.subr.mxu1 %v219_v5  ;;  %v282_v15 = vld [vmem:[%s2411_s1 + $0x778] sm:$0xff]  ;;  %v297_v17 = vld [vmem:[%s2411_s1 + $0x7f0] sm:$0xff]  ;;  %v296_v21 = vld [vmem:[%s2411_s1 + $0x7e8] sm:$0xff]  ;;  %p1506_p4 = pnand %p1505_p3, %p1499_p0 }
  0x67   :  { %1347 = vmatpush3.msra.mxu0 %v171_v6  ;;  %650 = vmatprep.mubr.f32.mxu0 %v36_v7  ;;  %v249_v18 = vld [vmem:[%s2411_s1 + $0x670] sm:$0xff]  ;;  %v248_v22 = vld [vmem:[%s2411_s1 + $0x668] sm:$0xff]  ;;  %v263_v24 = vld [vmem:[%s2411_s1 + $0x6e0] sm:$0xff] }
  0x68   :  { %1382 = vmatpush3.msra.mxu1 %v203_v8  ;;  %651 = vmatmul.mubr.f32.vlgmr.msra.gmra.mxu0 %v35_v9  ;;  %v281_v19 = vld [vmem:[%s2411_s1 + $0x770] sm:$0xff]  ;;  %v280_v23 = vld [vmem:[%s2411_s1 + $0x768] sm:$0xff]  ;;  %v295_v25 = vld [vmem:[%s2411_s1 + $0x7e0] sm:$0xff] }
  0x69   :  { %720 = vmatprep.mubr.f32.mxu1 %v38_v10  ;;  %1386 = vmatprep.subr.mxu0 %v266_v11  ;;  %v247_v26 = vld [vmem:[%s2411_s1 + $0x660] sm:$0xff]  ;;  %v262_v28 = vld [vmem:[%s2411_s1 + $0x6d8] sm:$0xff]  ;;  %v261_v32 = vld [vmem:[%s2411_s1 + $0x6d0] sm:$0xff] }
  0x6a   :  { %1421 = vmatprep.subr.mxu1 %v298_v12  ;;  %721 = vmatmul.mubr.f32.vlgmr.msra.gmra.mxu1 %v37_v13  ;;  %v279_v27 = vld [vmem:[%s2411_s1 + $0x760] sm:$0xff]  ;;  %v294_v29 = vld [vmem:[%s2411_s1 + $0x7d8] sm:$0xff]  ;;  %v293_v33 = vld [vmem:[%s2411_s1 + $0x7d0] sm:$0xff] }
  0x6b   :  { %1387 = vmatpush3.msra.mxu0 %v250_v14  ;;  %1422 = vmatpush3.msra.mxu1 %v282_v15  ;;  %v246_v30 = vld [vmem:[%s2411_s1 + $0x658] sm:$0xff]  ;;  %v245_v34 = vld [vmem:[%s2411_s1 + $0x650] sm:$0xff]  ;;  %v260_v36 = vld [vmem:[%s2411_s1 + $0x6c8] sm:$0xff] }
  0x6c   :  { %1388 = vmatprep.subr.mxu0 %v265_v16  ;;  %1423 = vmatprep.subr.mxu1 %v297_v17  ;;  %v278_v31 = vld [vmem:[%s2411_s1 + $0x758] sm:$0xff]  ;;  %v277_v35 = vld [vmem:[%s2411_s1 + $0x750] sm:$0xff]  ;;  %v292_v37 = vld [vmem:[%s2411_s1 + $0x7c8] sm:$0xff]  ;;  %v1520_v16 = vmov 0.0  }
  0x6d   :  { %1389 = vmatpush3.msra.mxu0 %v249_v18  ;;  %1424 = vmatpush3.msra.mxu1 %v281_v19  ;;  %v244_v38 = vld [vmem:[%s2411_s1 + $0x648] sm:$0xff]  ;;  %v259_v40 = vld [vmem:[%s2411_s1 + $0x6c0] sm:$0xff]  ;;  %v258_v44 = vld [vmem:[%s2411_s1 + $0x6b8] sm:$0xff] }
  0x6e   :  { %1390 = vmatprep.subr.mxu0 %v264_v20  ;;  %1425 = vmatprep.subr.mxu1 %v296_v21  ;;  %v276_v39 = vld [vmem:[%s2411_s1 + $0x748] sm:$0xff]  ;;  %v291_v41 = vld [vmem:[%s2411_s1 + $0x7c0] sm:$0xff]  ;;  %v290_v45 = vld [vmem:[%s2411_s1 + $0x7b8] sm:$0xff] }
  0x6f   :  { %1391 = vmatpush3.msra.mxu0 %v248_v22  ;;  %1426 = vmatpush3.msra.mxu1 %v280_v23  ;;  %v243_v42 = vld [vmem:[%s2411_s1 + $0x640] sm:$0xff]  ;;  %v242_v46 = vld [vmem:[%s2411_s1 + $0x638] sm:$0xff]  ;;  %v257_v48 = vld [vmem:[%s2411_s1 + $0x6b0] sm:$0xff] }
  0x70   :  { %1392 = vmatprep.subr.mxu0 %v263_v24  ;;  %1427 = vmatprep.subr.mxu1 %v295_v25  ;;  %v275_v43 = vld [vmem:[%s2411_s1 + $0x740] sm:$0xff]  ;;  %v274_v47 = vld [vmem:[%s2411_s1 + $0x738] sm:$0xff]  ;;  %v289_v49 = vld [vmem:[%s2411_s1 + $0x7b0] sm:$0xff] }
  0x71   :  { %1393 = vmatpush3.msra.mxu0 %v247_v26  ;;  %1428 = vmatpush3.msra.mxu1 %v279_v27  ;;  %v241_v50 = vld [vmem:[%s2411_s1 + $0x630] sm:$0xff]  ;;  %v256_v52 = vld [vmem:[%s2411_s1 + $0x6a8] sm:$0xff]  ;;  %v255_v56 = vld [vmem:[%s2411_s1 + $0x6a0] sm:$0xff] }
  0x72   :  { %1394 = vmatprep.subr.mxu0 %v262_v28  ;;  %1429 = vmatprep.subr.mxu1 %v294_v29  ;;  %v273_v51 = vld [vmem:[%s2411_s1 + $0x730] sm:$0xff]  ;;  %v288_v53 = vld [vmem:[%s2411_s1 + $0x7a8] sm:$0xff]  ;;  %v287_v57 = vld [vmem:[%s2411_s1 + $0x7a0] sm:$0xff] }
  0x73   :  { %1395 = vmatpush3.msra.mxu0 %v246_v30  ;;  %1430 = vmatpush3.msra.mxu1 %v278_v31  ;;  %v240_v54 = vld [vmem:[%s2411_s1 + $0x628] sm:$0xff]  ;;  %v239_v58 = vld [vmem:[%s2411_s1 + $0x620] sm:$0xff]  ;;  %v254_v60 = vld [vmem:[%s2411_s1 + $0x698] sm:$0xff] }
  0x74   :  { %1396 = vmatprep.subr.mxu0 %v261_v32  ;;  %1431 = vmatprep.subr.mxu1 %v293_v33  ;;  %v272_v55 = vld [vmem:[%s2411_s1 + $0x728] sm:$0xff]  ;;  %v271_v59 = vld [vmem:[%s2411_s1 + $0x720] sm:$0xff]  ;;  %v286_v61 = vld [vmem:[%s2411_s1 + $0x798] sm:$0xff] }
  0x75   :  { %1397 = vmatpush3.msra.mxu0 %v245_v34  ;;  %1432 = vmatpush3.msra.mxu1 %v277_v35  ;;  %v238_v62 = vld [vmem:[%s2411_s1 + $0x618] sm:$0xff]  ;;  %v253_v0 = vld [vmem:[%s2411_s1 + $0x690] sm:$0xff]  ;;  %v252_v4 = vld [vmem:[%s2411_s1 + $0x688] sm:$0xff] }
  0x76   :  { %1398 = vmatprep.subr.mxu0 %v260_v36  ;;  %1433 = vmatprep.subr.mxu1 %v292_v37  ;;  %v270_v63 = vld [vmem:[%s2411_s1 + $0x718] sm:$0xff]  ;;  %v285_v1 = vld [vmem:[%s2411_s1 + $0x790] sm:$0xff]  ;;  %v284_v5 = vld [vmem:[%s2411_s1 + $0x788] sm:$0xff] }
  0x77   :  { %1399 = vmatpush3.msra.mxu0 %v244_v38  ;;  %1434 = vmatpush3.msra.mxu1 %v276_v39  ;;  %v237_v2 = vld [vmem:[%s2411_s1 + $0x610] sm:$0xff]  ;;  %v236_v6 = vld [vmem:[%s2411_s1 + $0x608] sm:$0xff]  ;;  %v251_v8 = vld [vmem:[%s2411_s1 + $0x680] sm:$0xff] }
  0x78   :  { %1400 = vmatprep.subr.mxu0 %v259_v40  ;;  %1435 = vmatprep.subr.mxu1 %v291_v41  ;;  %v269_v3 = vld [vmem:[%s2411_s1 + $0x710] sm:$0xff]  ;;  %v268_v7 = vld [vmem:[%s2411_s1 + $0x708] sm:$0xff]  ;;  %v283_v9 = vld [vmem:[%s2411_s1 + $0x780] sm:$0xff] }
  0x79   :  { %1401 = vmatpush3.msra.mxu0 %v243_v42  ;;  %1436 = vmatpush3.msra.mxu1 %v275_v43  ;;  %v235_v10 = vld [vmem:[%s2411_s1 + $0x600] sm:$0xff]  ;;  %v40_v11 = vld [vmem:[%s2410_s0 + $0x68] sm:$0xff]  ;;  %v42_v13 = vld [vmem:[%s2410_s0 + $0x78] sm:$0xff] }
  0x7a   :  { %1402 = vmatprep.subr.mxu0 %v258_v44  ;;  %1437 = vmatprep.subr.mxu1 %v290_v45  ;;  %v267_v12 = vld [vmem:[%s2411_s1 + $0x700] sm:$0xff]  ;;  %v41_v15 = vld [vmem:[%s2410_s0 + $0x70] sm:$0xff]  ;;  %v867_v17 = vld [vmem:[%s2413_s3 + $0x8] sm:$0xff] }
  0x7b   :  { %1403 = vmatpush3.msra.mxu0 %v242_v46  ;;  %1438 = vmatpush3.msra.mxu1 %v274_v47  ;;  %v39_v14 = vld [vmem:[%s2410_s0 + $0x60] sm:$0xff] }
  0x7c   :  { %1404 = vmatprep.subr.mxu0 %v257_v48  ;;  %1439 = vmatprep.subr.mxu1 %v289_v49  ;;  %v866_v18 = vld [vmem:[%s2413_s3] sm:$0xff] }
  0x7d   :  { %1405 = vmatpush3.msra.mxu0 %v241_v50  ;;  %1440 = vmatpush3.msra.mxu1 %v273_v51  ;;  %v1170_v24 = vld [vmem:[%s2412_s2] ss:$0 sm:$0xff] }
  0x7e   :  { %1406 = vmatprep.subr.mxu0 %v256_v52  ;;  %1441 = vmatprep.subr.mxu1 %v288_v53  ;;  %v989_v52 = vld [vmem:[%s2415_s5 + $0x8] sm:$0xff]  ;;  %v988_v53 = vld [vmem:[%s2415_s5] sm:$0xff] }
  0x7f   :  { %1407 = vmatpush3.msra.mxu0 %v240_v54  ;;  %1442 = vmatpush3.msra.mxu1 %v272_v55  ;;  %v1171_v54 = vld [vmem:[%s2414_s4] ss:$0 sm:$0xff] }
  0x80   :  { %1408 = vmatprep.subr.mxu0 %v255_v56  ;;  %1443 = vmatprep.subr.mxu1 %v287_v57 }
  0x81   :  { %1409 = vmatpush3.msra.mxu0 %v239_v58  ;;  %1444 = vmatpush3.msra.mxu1 %v271_v59 }
  0x82   :  { %1410 = vmatprep.subr.mxu0 %v254_v60  ;;  %1445 = vmatprep.subr.mxu1 %v286_v61 }
  0x83   :  { %1411 = vmatpush3.msra.mxu0 %v238_v62  ;;  %1446 = vmatpush3.msra.mxu1 %v270_v63 }
  0x84   :  { %1412 = vmatprep.subr.mxu0 %v253_v0  ;;  %1447 = vmatprep.subr.mxu1 %v285_v1 }
  0x85   :  { %1413 = vmatpush3.msra.mxu0 %v237_v2  ;;  %1448 = vmatpush3.msra.mxu1 %v269_v3 }
  0x86   :  { %1414 = vmatprep.subr.mxu0 %v252_v4  ;;  %1449 = vmatprep.subr.mxu1 %v284_v5 }
  0x87   :  { %1415 = vmatpush3.msra.mxu0 %v236_v6  ;;  %1450 = vmatpush3.msra.mxu1 %v268_v7 }
  0x88   :  { %1416 = vmatprep.subr.mxu0 %v251_v8  ;;  %1451 = vmatprep.subr.mxu1 %v283_v9 }
  0x89   :  { %1417 = vmatpush3.msra.mxu0 %v235_v10  ;;  %790 = vmatprep.mubr.f32.mxu0 %v40_v11 }
  0x8a   :  { %1452 = vmatpush3.msra.mxu1 %v267_v12  ;;  %860 = vmatprep.mubr.f32.mxu1 %v42_v13 }
  0x8b   :  { %791 = vmatmul.mubr.f32.vlgmr.msra.gmra.mxu0 %v39_v14  ;;  %861 = vmatmul.mubr.f32.vlgmr.msra.gmra.mxu1 %v41_v15 }
  0x8c   :  { %1465 = vmatprep.subr.mxu0 %v1520_v16  ;;  %1472 = vmatprep.subr.mxu1 %v1520_v16 }
  0x8d   :  { %1466 = vmatpush3.msra.mxu0 %v867_v17  ;;  %1469 = vmatprep.mubr.msk.f32.mxu0 %vm1521_vm0, %v1520_v16 }
  0x8e   :  { %1467 = vmatprep.subr.mxu0 %v1520_v16  ;;  %1476 = vmatprep.mubr.msk.f32.mxu1 %vm1521_vm0, %v1520_v16 }
  0x8f   :  { %1468 = vmatpush3.msra.mxu0 %v866_v18  ;;  %1473 = vmatpush3.msra.mxu1 %v989_v52 }
  0x90   :  { %1479 = vmatprep.subr.mxu0 %v1520_v16  ;;  %1474 = vmatprep.subr.mxu1 %v1520_v16 }
  0x91   :  { %1475 = vmatpush3.msra.mxu1 %v988_v53 }
  0xe4   :  { %v1208_v19 = vpop.f32.mrf.mxu0 }
  0xe6   :  { %v1243_v20 = vpop.f32.mrf.mxu1  ;;  %v1209_v21 = vpop.f32.mrf.mxu0 }
  0xe7   :  { %v1210_v23 = vadd.f32 %v1209_v21, %v1208_v19 }
  0xe8   :  { %v1244_v25 = vpop.f32.mrf.mxu1 }
  0xe9   :  { %v373_v28 = vadd.f32 %v1210_v23, %v1170_v24  ;;  %v1245_v29 = vadd.f32 %v1244_v25, %v1243_v20 }
  0xeb   :  { %v443_v33 = vadd.f32 %v1245_v29, %v373_v28 }
 0x106   :  { %v1278_v22 = vpop.f32.mrf.mxu0 }
 0x108   :  { %v1313_v26 = vpop.f32.mrf.mxu1  ;;  %v1279_v27 = vpop.f32.mrf.mxu0 }
 0x109   :  { %v1280_v31 = vadd.f32 %v1279_v27, %v1278_v22 }
 0x10a   :  { %v1314_v32 = vpop.f32.mrf.mxu1 }
 0x10b   :  { %v513_v36 = vadd.f32 %v1280_v31, %v443_v33  ;;  %v1315_v37 = vadd.f32 %v1314_v32, %v1313_v26  ;;  %v1139_v33 = vlaneseq }
 0x10d   :  { %v583_v40 = vadd.f32 %v1315_v37, %v513_v36  ;;  %v1136_v36 = vld [vmem:[%s2416_s6] sm:$0x1] }
 0x10e   :  { %vm1137_vm2 = vcmp.eq.f32.partialorder %v1136_v36, 0.0 }
 0x128   :  { %v1348_v30 = vpop.f32.mrf.mxu0 }
 0x12a   :  { %v1383_v34 = vpop.f32.mrf.mxu1  ;;  %v1349_v35 = vpop.f32.mrf.mxu0 }
 0x12b   :  { %v1350_v38 = vadd.f32 %v1349_v35, %v1348_v30 }
 0x12c   :  { %v1384_v39 = vpop.f32.mrf.mxu1 }
 0x12d   :  { %v653_v41 = vadd.f32 %v1350_v38, %v583_v40  ;;  %v1385_v42 = vadd.f32 %v1384_v39, %v1383_v34  ;;  %v1140_v34 = vshrl.u32 %v1139_v33, 7  ;;  %v1522_v39 = vmov 0  }
 0x12e   :  { %v1147_v40 = vsel %vm1137_vm2, 1, %v1522_v39 }
 0x12f   :  { %v723_v47 = vadd.f32 %v1385_v42, %v653_v41  ;;  %v1141_v35 = vsub.s32 0, %v1140_v34 }
 0x131   :  { %v1142_v37 = vrot.slane %v1136_v36, %v1141_v35  ;;  %v1151_v42 = vrot.slane %v1147_v40, %v1141_v35 }
 0x133   :  { %vm1152_vm3 = vcmp.eq.s32.totalorder %v1151_v42, 1 }
 0x14b   :  { %v1418_v43 = vpop.f32.mrf.mxu0  ;;  %v1453_v44 = vpop.f32.mrf.mxu1 }
 0x14d   :  { %v1419_v45 = vpop.f32.mrf.mxu0  ;;  %v1454_v46 = vpop.f32.mrf.mxu1 }
 0x14e   :  { %v1420_v48 = vadd.f32 %v1419_v45, %v1418_v43  ;;  %v1455_v50 = vadd.f32 %v1454_v46, %v1453_v44 }
 0x150   :  { %v793_v49 = vadd.f32 %v1420_v48, %v723_v47 }
 0x152   :  { %v863_v51 = vadd.f32 %v1455_v50, %v793_v49 }
 0x154   :  { %1470 = vmatmul.mubr.msk.f32.vlgmr.msra.gmra.mxu0 %vm875_vm1, %v863_v51 }
 0x155   :  { %1483 = vmatprep.mubr.msk.f32.mxu0 %vm1521_vm0, %v1520_v16  ;;  %1480 = vmatpush3.msra.mxu0 %v989_v52 }
 0x156   :  { %1481 = vmatprep.subr.mxu0 %v1520_v16 }
 0x157   :  { %1482 = vmatpush3.msra.mxu0 %v988_v53 }
 0x214   :  { %v945_v55 = vpop.f32.mrf.mxu0 }
 0x215   :  { %v946_v56 = vadd.f32 %v1171_v54, %v945_v55 }
 0x216   :  { %v1471_v57 = vpop.f32.mrf.mxu0 }
 0x217   :  { %v1173_v58 = vmul.f32 -1.442695, %v946_v56 }
 0x219   :  { %1490 = vpow2.f32 %v1173_v58 }
 0x226   :  { %v1491_v59 = vpop.eup %1490 }
 0x227   :  { %v952_v60 = vadd.f32 1.0, %v1491_v59 }
 0x229   :  { %1492 = vrcp.f32 %v952_v60 }
 0x236   :  { %v1493_v61 = vpop.eup %1492 }
 0x237   :  { %v955_v62 = vmul.f32 8.0, %v1493_v61 }
 0x239   :  { %v956_v63 = vmul.f32 %v955_v62, %v955_v62 }
 0x23b   :  { %v957_v0 = vmax.f32 %v956_v63, 1e-30 }
 0x23d   :  { %1494 = vrcp.f32 %v957_v0 }
 0x24a   :  { %v1495_v1 = vpop.eup %1494 }
 0x24b   :  { %1484 = vmatmul.mubr.msk.f32.vlgmr.msra.gmra.mxu0 %vm875_vm1, %v1495_v1  ;;  %v959_v2 = vsub.f32 1.0, %v1495_v1  ;;  %v962_v3 = vmul.f32 4.0, %v1495_v1  ;;  %v966_v4 = vmul.f32 9.0, %v1495_v1  ;;  %v970_v5 = vmul.f32 16.0, %v1495_v1 }
 0x24c   :  { %v974_v9 = vmul.f32 25.0, %v1495_v1  ;;  %v978_v13 = vmul.f32 36.0, %v1495_v1  ;;  %v982_v17 = vmul.f32 49.0, %v1495_v1 }
 0x24d   :  { %v960_v6 = vmax.f32 %v959_v2, 0.0  ;;  %v963_v7 = vsub.f32 1.0, %v962_v3  ;;  %v967_v8 = vsub.f32 1.0, %v966_v4  ;;  %v971_v12 = vsub.f32 1.0, %v970_v5 }
 0x24e   :  { %v975_v16 = vsub.f32 1.0, %v974_v9  ;;  %v979_v20 = vsub.f32 1.0, %v978_v13  ;;  %v983_v23 = vsub.f32 1.0, %v982_v17 }
 0x24f   :  { %v961_v10 = vadd.f32 1.0, %v960_v6  ;;  %v964_v11 = vmax.f32 %v963_v7, 0.0  ;;  %v968_v15 = vmax.f32 %v967_v8, 0.0  ;;  %v972_v19 = vmax.f32 %v971_v12, 0.0 }
 0x250   :  { %v976_v22 = vmax.f32 %v975_v16, 0.0  ;;  %v980_v25 = vmax.f32 %v979_v20, 0.0  ;;  %v984_v27 = vmax.f32 %v983_v23, 0.0 }
 0x251   :  { %v965_v14 = vadd.f32 %v964_v11, %v961_v10 }
 0x253   :  { %v969_v18 = vadd.f32 %v968_v15, %v965_v14 }
 0x255   :  { %v973_v21 = vadd.f32 %v972_v19, %v969_v18 }
 0x257   :  { %v977_v24 = vadd.f32 %v976_v22, %v973_v21 }
 0x259   :  { %v981_v26 = vadd.f32 %v980_v25, %v977_v24 }
 0x25b   :  { %v985_v28 = vadd.f32 %v984_v27, %v981_v26 }
 0x25d   :  { %1496 = vrcp.f32 %v985_v28 }
 0x26a   :  { %v1497_v29 = vpop.eup %1496 }
 0x26b   :  { %v987_v30 = vmul.f32 %v1497_v29, %v863_v51 }
 0x26d   :  { %1477 = vmatmul.mubr.msk.f32.vlgmr.msra.gmra.mxu1 %vm875_vm1, %v987_v30 }
 0x30b   :  { %v1132_v31 = vpop.f32.mrf.mxu0 }
 0x30c   :  { %v1144_v38 = vmul.f32 %v1142_v37, %v1132_v31 }
 0x30d   :  { %v1485_v32 = vpop.f32.mrf.mxu0 }
 0x30e   :  { %v1145_v41 = vsub.f32 1.0, %v1144_v38 }
 0x310   :  { %v1146_v43 = vmax.f32 %v1145_v41, 0.0 }
 0x312   :  { %v1153_v45 = vsel %vm1152_vm3, 1.0, %v1146_v43 }
 0x32d   :  { %v1059_v44 = vpop.f32.mrf.mxu1 }
 0x32e   :  { %v1154_v46 = vmul.f32 %v1153_v45, %v1059_v44 }
 0x32f   :  { %v1478_v47 = vpop.f32.mrf.mxu1 }
 0x330   :  { %1155 = vst [vmem:[#allocation2] sm:$0xff] %v1154_v46 }
 0x331   :  { %1509 = shalt.err (!%p1506_p4)
}
 0x332   :  { %1165 = dma.vmem_to_hbm [thread:$0]  %s1163_s25, 128, %s2417_s7, [#allocation3]  }
 0x333   :  { %1518 = dma.done.wait [#allocation3], 128  }
 0x334   :  { %1519 = vsyncadd [#allocation3], 4294967168 }
 0x335   :  { %1169 = vsyncpa [#allocation3], 1 }

</bundles_post_ra>
